<compile_context>
chip_gen: v7x
topology: tpu7x:2x2x1
jax: 0.10.0
libtpu: 0.0.40
codegen_flags: <defaults>
</compile_context>

<pallas_src>
import math

import jax
import jax.numpy as jnp
from jax import lax
from jax.experimental import pallas as pl
from jax.experimental.pallas import tpu as pltpu


_INV_SQRT2 = 1.0 / math.sqrt(2.0)


def _gelu_exact(v):
    # PyTorch nn.GELU() default: exact erf-based GELU (computed in f32).
    return 0.5 * v * (1.0 + lax.erf(v * _INV_SQRT2))


def _layernorm(v, gamma, beta, eps=1e-5):
    mu = jnp.mean(v, axis=-1, keepdims=True)
    var = jnp.mean((v - mu) * (v - mu), axis=-1, keepdims=True)
    return (v - mu) * lax.rsqrt(var + eps) * gamma + beta


def encoder_kernel(x_ref, w1t_ref, b1_ref, w2_ref, b2c_ref, g1_ref, be1_ref,
                   o_ref):
    """One grid step: a group of G batch elements, fully resident in VMEM."""
    G, S, D = x_ref.shape

    # Small params, promoted once to f32 for element-wise / LayerNorm math.
    b1 = b1_ref[...].astype(jnp.float32)        # (1, D)
    b2c = b2c_ref[...].astype(jnp.float32)      # (S, 1)
    g1 = g1_ref[...].astype(jnp.float32)        # (1, D)  norm1 weight
    be1 = be1_ref[...].astype(jnp.float32)      # (1, D)  norm1 bias

    x = x_ref[...]                              # (G, S, D) storage dtype
    xf = x.astype(jnp.float32)

    # ---- ff1: Linear(d_model, d_model) + GELU, all G batches in one matmul.
    # MXU operands stay in storage dtype; f32 accumulation via preferred type.
    h1 = jnp.dot(x.reshape(G * S, D), w1t_ref[...],
                 preferred_element_type=jnp.float32)            # (G*S, D) f32
    h1 = _gelu_exact(h1 + b1)
    # residual + norm1
    y0 = _layernorm(h1 + xf.reshape(G * S, D), g1, be1)          # (G*S, D) f32
    y0 = y0.reshape(G, S, D)

    # ---- ff2: permute(0,2,1) -> Linear(enc_in) -> permute back, rewritten
    # WITHOUT transposes:  y1[g] = GELU(W2 @ y0[g] + b2[:, None]).
    w2 = w2_ref[...]                            # (S, S) storage dtype
    for g in range(G):                          # static unroll, G is small
        y0g = y0[g]                             # (S, D) f32
        h2 = jnp.dot(w2, y0g.astype(w2.dtype),
                     preferred_element_type=jnp.float32)         # (S, D) f32
        y1g = _gelu_exact(h2 + b2c)
        # gated residual + norm1 (the module reuses norm1, not norm2)
        y2g = _layernorm(y1g * y0g + xf[g], g1, be1)
        o_ref[g] = y2g.astype(o_ref.dtype)


def encoder_forward(x, params, *, batch_group=None):
    """x: (B, S, D). params: dict of weights (see init_params)."""
    B, S, D = x.shape
    w1t, b1 = params["w1t"], params["b1"]
    w2, b2c = params["w2"], params["b2c"]
    g1, be1 = params["g1"], params["be1"]

    if batch_group is None:
        # Keep >=2 grid steps (feeds both v7x TensorCores) while folding as
        # many batch elements as possible into each step's matmuls.
        batch_group = max(1, B // 2)
        while B % batch_group:
            batch_group -= 1
    G = batch_group
    assert B % G == 0, "batch_group must divide the batch size"

    x_item = jnp.dtype(x.dtype).itemsize
    w_item = jnp.dtype(w1t.dtype).itemsize

    # Advisory cost hint so XLA can schedule neighbours to overlap this call.
    flops = 2 * B * S * D * D + 2 * B * S * S * D + 12 * B * S * D
    transcendentals = 2 * B * S * D
    bytes_accessed = (2 * B * S * D * x_item
                      + (D * D + S * S + 3 * D + S) * w_item)

    # VMEM budget: double-buffered activation blocks + weight blocks, with
    # headroom; clamped so it also fits v7x's 64 MiB/TensorCore.
    block_bytes = (2 * 2 * G * S * D * x_item
                   + 2 * (D * D + S * S + 3 * D + S) * w_item)
    vmem_limit = int(min(64 * 1024 * 1024,
                         max(16 * 1024 * 1024, 4 * block_bytes)))

    grid_spec = pltpu.PrefetchScalarGridSpec(
        num_scalar_prefetch=0,
        grid=(B // G,),
        in_specs=[
            pl.BlockSpec((G, S, D), lambda b: (b, 0, 0)),   # x
            # The blocks below have constant index maps, so Pallas only DMAs
            # them on the first grid step.  For very large d_model, store the
            # weights in bf16 (or single-buffer via pipeline_mode) to halve
            # their VMEM footprint.
            pl.BlockSpec((D, D), lambda b: (0, 0)),         # W1.T
            pl.BlockSpec((1, D), lambda b: (0, 0)),         # b1
            pl.BlockSpec((S, S), lambda b: (0, 0)),         # W2 (untransposed)
            pl.BlockSpec((S, 1), lambda b: (0, 0)),         # b2 as a column
            pl.BlockSpec((1, D), lambda b: (0, 0)),         # norm1 gamma
            pl.BlockSpec((1, D), lambda b: (0, 0)),         # norm1 beta
        ],
        out_specs=pl.BlockSpec((G, S, D), lambda b: (b, 0, 0)),
    )

    return pl.pallas_call(
        encoder_kernel,
        out_shape=jax.ShapeDtypeStruct((B, S, D), x.dtype),
        grid_spec=grid_spec,
        compiler_params=pltpu.CompilerParams(
            dimension_semantics=("parallel",),
            vmem_limit_bytes=vmem_limit),
        cost_estimate=pl.CostEstimate(
            flops=flops, transcendentals=transcendentals,
            bytes_accessed=bytes_accessed),
    )(x, w1t, b1, w2, b2c, g1, be1)


def init_params(key, d_model, enc_in):
    """Deterministic synthetic parameter init (shapes follow the nn.Module)."""
    k1, k2, k3, k4 = jax.random.split(key, 4)
    # nn.Linear(d_model, d_model): W (d_model, d_model), b (d_model,)
    lim1 = 1.0 / math.sqrt(d_model)
    w1 = jax.random.uniform(k1, (d_model, d_model), jnp.float32, -lim1, lim1)
    b1 = jax.random.uniform(k2, (d_model,), jnp.float32, -lim1, lim1)
    # nn.Linear(enc_in, enc_in): W (enc_in, enc_in), b (enc_in,)
    lim2 = 1.0 / math.sqrt(enc_in)
    w2 = jax.random.uniform(k3, (enc_in, enc_in), jnp.float32, -lim2, lim2)
    b2 = jax.random.uniform(k4, (enc_in,), jnp.float32, -lim2, lim2)
    # LayerNorm(d_model): weight=1, bias=0 (PyTorch default init)
    g1 = jnp.ones((d_model,), jnp.float32)
    be1 = jnp.zeros((d_model,), jnp.float32)
    # TODO(synk): norm2 is defined in __init__ but never used in forward; omitted.
    return {
        "w1t": w1.T,                        # (D, D) so ff1 is x @ W1.T
        "b1": b1.reshape(1, d_model),
        "w2": w2,                           # (S, S), used as W2 @ y0 (no transposes)
        "b2c": b2.reshape(enc_in, 1),       # column bias for the transpose-free ff2
        "g1": g1.reshape(1, d_model),
        "be1": be1.reshape(1, d_model),
    }


def encoder_reference(x, params):
    """Pure-JAX reference: literal translation of the PyTorch forward."""
    w1t, b1 = params["w1t"], params["b1"]
    w2, b2c = params["w2"], params["b2c"]
    g1, be1 = params["g1"], params["be1"]

    def ln(v):
        mu = jnp.mean(v, axis=-1, keepdims=True)
        var = jnp.mean((v - mu) ** 2, axis=-1, keepdims=True)
        return (v - mu) / jnp.sqrt(var + 1e-5) * g1 + be1

    gelu = lambda v: 0.5 * v * (1.0 + lax.erf(v / math.sqrt(2.0)))
    y0 = ln(gelu(x @ w1t + b1) + x)
    # permute(0, 2, 1) -> Linear(enc_in) -> permute back (as in PyTorch)
    y1 = jnp.transpose(
        gelu(jnp.transpose(y0, (0, 2, 1)) @ w2.T + b2c[:, 0]), (0, 2, 1))
    return ln(y1 * y0 + x)


if __name__ == "__main__":
    # d_model a multiple of 128 -> lane-dense output stores; enc_in=8 matches
    # the sublane tile; B=4 gives 2 parallel grid steps of 2 batches each.
    B, enc_in, d_model = 4, 8, 128
    key = jax.random.PRNGKey(0)
    kx, kp = jax.random.split(key)
    x = jax.random.normal(kx, (B, enc_in, d_model), jnp.float32)
    params = init_params(kp, d_model, enc_in)

    out = jax.block_until_ready(encoder_forward(x, params))
    ref = encoder_reference(x, params)

    assert out.shape == (B, enc_in, d_model)
    assert jnp.allclose(out, ref, atol=2e-3, rtol=2e-3), (
        "max abs err = %g" % float(jnp.max(jnp.abs(out - ref))))
    print("KERNEL_OK")
</pallas_src>

<mosaic_0001>
module attributes {stable_mosaic.version = 11 : i64} {
  func.func @encoder_kernel(%arg0: i32, %arg1: memref<2x8x128xf32, #tpu.memory_space<vmem>>, %arg2: memref<128x128xf32, #tpu.memory_space<vmem>>, %arg3: memref<1x128xf32, #tpu.memory_space<vmem>>, %arg4: memref<8x8xf32, #tpu.memory_space<vmem>>, %arg5: memref<8x1xf32, #tpu.memory_space<vmem>>, %arg6: memref<1x128xf32, #tpu.memory_space<vmem>>, %arg7: memref<1x128xf32, #tpu.memory_space<vmem>>, %arg8: memref<2x8x128xf32, #tpu.memory_space<vmem>>) attributes {dimension_semantics = [#tpu.dimension_semantics<parallel>], iteration_bounds = array<i64: 2>, scalar_prefetch = 0 : i64, scratch_operands = 0 : i64, tpu.core_type = #tpu.core_type<tc>, window_params = [{transform_indices = @transform_0, window_bounds = array<i64: 2, 8, 128>}, {pipeline_mode = #tpu.pipeline_mode<synchronous>, transform_indices = @transform_1, window_bounds = array<i64: 128, 128>}, {pipeline_mode = #tpu.pipeline_mode<synchronous>, transform_indices = @transform_2, window_bounds = array<i64: 1, 128>}, {pipeline_mode = #tpu.pipeline_mode<synchronous>, transform_indices = @transform_3, window_bounds = array<i64: 8, 8>}, {pipeline_mode = #tpu.pipeline_mode<synchronous>, transform_indices = @transform_4, window_bounds = array<i64: 8, 1>}, {pipeline_mode = #tpu.pipeline_mode<synchronous>, transform_indices = @transform_5, window_bounds = array<i64: 1, 128>}, {pipeline_mode = #tpu.pipeline_mode<synchronous>, transform_indices = @transform_6, window_bounds = array<i64: 1, 128>}, {transform_indices = @transform_7, window_bounds = array<i64: 2, 8, 128>}]} {
    %c0 = arith.constant 0 : index
    %c0_0 = arith.constant 0 : index
    %0 = vector.load %arg3[%c0, %c0_0] : memref<1x128xf32, #tpu.memory_space<vmem>>, vector<1x128xf32>
    %c0_1 = arith.constant 0 : index
    %c0_2 = arith.constant 0 : index
    %1 = vector.load %arg5[%c0_1, %c0_2] : memref<8x1xf32, #tpu.memory_space<vmem>>, vector<8x1xf32>
    %c0_3 = arith.constant 0 : index
    %c0_4 = arith.constant 0 : index
    %2 = vector.load %arg6[%c0_3, %c0_4] : memref<1x128xf32, #tpu.memory_space<vmem>>, vector<1x128xf32>
    %c0_5 = arith.constant 0 : index
    %c0_6 = arith.constant 0 : index
    %3 = vector.load %arg7[%c0_5, %c0_6] : memref<1x128xf32, #tpu.memory_space<vmem>>, vector<1x128xf32>
    %c0_7 = arith.constant 0 : index
    %c0_8 = arith.constant 0 : index
    %c0_9 = arith.constant 0 : index
    %4 = vector.load %arg1[%c0_7, %c0_8, %c0_9] : memref<2x8x128xf32, #tpu.memory_space<vmem>>, vector<2x8x128xf32>
    %5 = vector.shape_cast %4 : vector<2x8x128xf32> to vector<16x128xf32>
    %c0_10 = arith.constant 0 : index
    %c0_11 = arith.constant 0 : index
    %6 = vector.load %arg2[%c0_10, %c0_11] : memref<128x128xf32, #tpu.memory_space<vmem>>, vector<128x128xf32>
    %cst = arith.constant dense<0.000000e+00> : vector<16x128xf32>
    %7 = tpu.matmul %5, %6, %cst {dimension_numbers = #tpu.dot_dimension_numbers<[1], [0], [0], [1], [0, 0, 1, 1], [], []>} : vector<16x128xf32>, vector<128x128xf32>, vector<16x128xf32> -> vector<16x128xf32>
    %8 = vector.broadcast %0 : vector<1x128xf32> to vector<16x128xf32>
    %9 = arith.addf %7, %8 : vector<16x128xf32>
    %cst_12 = arith.constant 5.000000e-01 : f32
    %10 = vector.broadcast %cst_12 : f32 to vector<16x128xf32>
    %11 = arith.mulf %10, %9 : vector<16x128xf32>
    %cst_13 = arith.constant 0.707106769 : f32
    %12 = vector.broadcast %cst_13 : f32 to vector<16x128xf32>
    %13 = arith.mulf %9, %12 : vector<16x128xf32>
    %14 = math.erf %13 : vector<16x128xf32>
    %cst_14 = arith.constant 1.000000e+00 : f32
    %15 = vector.broadcast %cst_14 : f32 to vector<16x128xf32>
    %16 = arith.addf %15, %14 : vector<16x128xf32>
    %17 = arith.mulf %11, %16 : vector<16x128xf32>
    %18 = vector.shape_cast %4 : vector<2x8x128xf32> to vector<16x128xf32>
    %19 = arith.addf %17, %18 : vector<16x128xf32>
    %cst_15 = arith.constant dense<0.000000e+00> : vector<16xf32>
    %20 = vector.multi_reduction <add>, %19, %cst_15 [1] : vector<16x128xf32> to vector<16xf32>
    %21 = vector.shape_cast %20 : vector<16xf32> to vector<16x1xf32>
    %cst_16 = arith.constant 1.280000e+02 : f32
    %22 = vector.broadcast %cst_16 : f32 to vector<16x1xf32>
    %23 = arith.divf %21, %22 : vector<16x1xf32>
    %24 = vector.broadcast %23 : vector<16x1xf32> to vector<16x128xf32>
    %25 = arith.subf %19, %24 : vector<16x128xf32>
    %26 = vector.broadcast %23 : vector<16x1xf32> to vector<16x128xf32>
    %27 = arith.subf %19, %26 : vector<16x128xf32>
    %28 = arith.mulf %25, %27 : vector<16x128xf32>
    %cst_17 = arith.constant dense<0.000000e+00> : vector<16xf32>
    %29 = vector.multi_reduction <add>, %28, %cst_17 [1] : vector<16x128xf32> to vector<16xf32>
    %30 = vector.shape_cast %29 : vector<16xf32> to vector<16x1xf32>
    %cst_18 = arith.constant 1.280000e+02 : f32
    %31 = vector.broadcast %cst_18 : f32 to vector<16x1xf32>
    %32 = arith.divf %30, %31 : vector<16x1xf32>
    %33 = vector.broadcast %23 : vector<16x1xf32> to vector<16x128xf32>
    %34 = arith.subf %19, %33 : vector<16x128xf32>
    %cst_19 = arith.constant 9.99999974E-6 : f32
    %35 = vector.broadcast %cst_19 : f32 to vector<16x1xf32>
    %36 = arith.addf %32, %35 : vector<16x1xf32>
    %37 = math.rsqrt %36 : vector<16x1xf32>
    %38 = vector.broadcast %37 : vector<16x1xf32> to vector<16x128xf32>
    %39 = arith.mulf %34, %38 : vector<16x128xf32>
    %40 = vector.broadcast %2 : vector<1x128xf32> to vector<16x128xf32>
    %41 = arith.mulf %39, %40 : vector<16x128xf32>
    %42 = vector.broadcast %3 : vector<1x128xf32> to vector<16x128xf32>
    %43 = arith.addf %41, %42 : vector<16x128xf32>
    %44 = vector.shape_cast %43 : vector<16x128xf32> to vector<2x8x128xf32>
    %c0_20 = arith.constant 0 : index
    %c0_21 = arith.constant 0 : index
    %45 = vector.load %arg4[%c0_20, %c0_21] : memref<8x8xf32, #tpu.memory_space<vmem>>, vector<8x8xf32>
    %46 = vector.extract_strided_slice %44 {offsets = [0, 0, 0], sizes = [1, 8, 128], strides = [1, 1, 1]} : vector<2x8x128xf32> to vector<1x8x128xf32>
    %47 = vector.shape_cast %46 : vector<1x8x128xf32> to vector<8x128xf32>
    %cst_22 = arith.constant dense<0.000000e+00> : vector<8x128xf32>
    %48 = tpu.matmul %45, %47, %cst_22 {dimension_numbers = #tpu.dot_dimension_numbers<[1], [0], [0], [1], [0, 0, 1, 1], [], []>} : vector<8x8xf32>, vector<8x128xf32>, vector<8x128xf32> -> vector<8x128xf32>
    %49 = vector.broadcast %1 : vector<8x1xf32> to vector<8x128xf32>
    %50 = arith.addf %48, %49 : vector<8x128xf32>
    %cst_23 = arith.constant 5.000000e-01 : f32
    %51 = vector.broadcast %cst_23 : f32 to vector<8x128xf32>
    %52 = arith.mulf %51, %50 : vector<8x128xf32>
    %cst_24 = arith.constant 0.707106769 : f32
    %53 = vector.broadcast %cst_24 : f32 to vector<8x128xf32>
    %54 = arith.mulf %50, %53 : vector<8x128xf32>
    %55 = math.erf %54 : vector<8x128xf32>
    %cst_25 = arith.constant 1.000000e+00 : f32
    %56 = vector.broadcast %cst_25 : f32 to vector<8x128xf32>
    %57 = arith.addf %56, %55 : vector<8x128xf32>
    %58 = arith.mulf %52, %57 : vector<8x128xf32>
    %59 = arith.mulf %58, %47 : vector<8x128xf32>
    %60 = vector.extract_strided_slice %4 {offsets = [0, 0, 0], sizes = [1, 8, 128], strides = [1, 1, 1]} : vector<2x8x128xf32> to vector<1x8x128xf32>
    %61 = vector.shape_cast %60 : vector<1x8x128xf32> to vector<8x128xf32>
    %62 = arith.addf %59, %61 : vector<8x128xf32>
    %cst_26 = arith.constant dense<0.000000e+00> : vector<8xf32>
    %63 = vector.multi_reduction <add>, %62, %cst_26 [1] : vector<8x128xf32> to vector<8xf32>
    %64 = vector.shape_cast %63 : vector<8xf32> to vector<8x1xf32>
    %cst_27 = arith.constant 1.280000e+02 : f32
    %65 = vector.broadcast %cst_27 : f32 to vector<8x1xf32>
    %66 = arith.divf %64, %65 : vector<8x1xf32>
    %67 = vector.broadcast %66 : vector<8x1xf32> to vector<8x128xf32>
    %68 = arith.subf %62, %67 : vector<8x128xf32>
    %69 = vector.broadcast %66 : vector<8x1xf32> to vector<8x128xf32>
    %70 = arith.subf %62, %69 : vector<8x128xf32>
    %71 = arith.mulf %68, %70 : vector<8x128xf32>
    %cst_28 = arith.constant dense<0.000000e+00> : vector<8xf32>
    %72 = vector.multi_reduction <add>, %71, %cst_28 [1] : vector<8x128xf32> to vector<8xf32>
    %73 = vector.shape_cast %72 : vector<8xf32> to vector<8x1xf32>
    %cst_29 = arith.constant 1.280000e+02 : f32
    %74 = vector.broadcast %cst_29 : f32 to vector<8x1xf32>
    %75 = arith.divf %73, %74 : vector<8x1xf32>
    %76 = vector.broadcast %66 : vector<8x1xf32> to vector<8x128xf32>
    %77 = arith.subf %62, %76 : vector<8x128xf32>
    %cst_30 = arith.constant 9.99999974E-6 : f32
    %78 = vector.broadcast %cst_30 : f32 to vector<8x1xf32>
    %79 = arith.addf %75, %78 : vector<8x1xf32>
    %80 = math.rsqrt %79 : vector<8x1xf32>
    %81 = vector.broadcast %80 : vector<8x1xf32> to vector<8x128xf32>
    %82 = arith.mulf %77, %81 : vector<8x128xf32>
    %83 = vector.broadcast %2 : vector<1x128xf32> to vector<8x128xf32>
    %84 = arith.mulf %82, %83 : vector<8x128xf32>
    %85 = vector.broadcast %3 : vector<1x128xf32> to vector<8x128xf32>
    %86 = arith.addf %84, %85 : vector<8x128xf32>
    %c0_31 = arith.constant 0 : index
    %c0_32 = arith.constant 0 : index
    %c0_33 = arith.constant 0 : index
    %87 = vector.load %arg8[%c0_31, %c0_32, %c0_33] : memref<2x8x128xf32, #tpu.memory_space<vmem>>, vector<1x8x128xf32>
    %88 = vector.shape_cast %87 : vector<1x8x128xf32> to vector<8x128xf32>
    %89 = vector.shape_cast %86 : vector<8x128xf32> to vector<1x8x128xf32>
    tpu.vector_store %arg8[%c0_31, %c0_32, %c0_33], %89 {strides = array<i32>} : memref<2x8x128xf32, #tpu.memory_space<vmem>>, vector<1x8x128xf32>,
    %90 = vector.extract_strided_slice %44 {offsets = [1, 0, 0], sizes = [1, 8, 128], strides = [1, 1, 1]} : vector<2x8x128xf32> to vector<1x8x128xf32>
    %91 = vector.shape_cast %90 : vector<1x8x128xf32> to vector<8x128xf32>
    %cst_34 = arith.constant dense<0.000000e+00> : vector<8x128xf32>
    %92 = tpu.matmul %45, %91, %cst_34 {dimension_numbers = #tpu.dot_dimension_numbers<[1], [0], [0], [1], [0, 0, 1, 1], [], []>} : vector<8x8xf32>, vector<8x128xf32>, vector<8x128xf32> -> vector<8x128xf32>
    %93 = vector.broadcast %1 : vector<8x1xf32> to vector<8x128xf32>
    %94 = arith.addf %92, %93 : vector<8x128xf32>
    %cst_35 = arith.constant 5.000000e-01 : f32
    %95 = vector.broadcast %cst_35 : f32 to vector<8x128xf32>
    %96 = arith.mulf %95, %94 : vector<8x128xf32>
    %cst_36 = arith.constant 0.707106769 : f32
    %97 = vector.broadcast %cst_36 : f32 to vector<8x128xf32>
    %98 = arith.mulf %94, %97 : vector<8x128xf32>
    %99 = math.erf %98 : vector<8x128xf32>
    %cst_37 = arith.constant 1.000000e+00 : f32
    %100 = vector.broadcast %cst_37 : f32 to vector<8x128xf32>
    %101 = arith.addf %100, %99 : vector<8x128xf32>
    %102 = arith.mulf %96, %101 : vector<8x128xf32>
    %103 = arith.mulf %102, %91 : vector<8x128xf32>
    %104 = vector.extract_strided_slice %4 {offsets = [1, 0, 0], sizes = [1, 8, 128], strides = [1, 1, 1]} : vector<2x8x128xf32> to vector<1x8x128xf32>
    %105 = vector.shape_cast %104 : vector<1x8x128xf32> to vector<8x128xf32>
    %106 = arith.addf %103, %105 : vector<8x128xf32>
    %cst_38 = arith.constant dense<0.000000e+00> : vector<8xf32>
    %107 = vector.multi_reduction <add>, %106, %cst_38 [1] : vector<8x128xf32> to vector<8xf32>
    %108 = vector.shape_cast %107 : vector<8xf32> to vector<8x1xf32>
    %cst_39 = arith.constant 1.280000e+02 : f32
    %109 = vector.broadcast %cst_39 : f32 to vector<8x1xf32>
    %110 = arith.divf %108, %109 : vector<8x1xf32>
    %111 = vector.broadcast %110 : vector<8x1xf32> to vector<8x128xf32>
    %112 = arith.subf %106, %111 : vector<8x128xf32>
    %113 = vector.broadcast %110 : vector<8x1xf32> to vector<8x128xf32>
    %114 = arith.subf %106, %113 : vector<8x128xf32>
    %115 = arith.mulf %112, %114 : vector<8x128xf32>
    %cst_40 = arith.constant dense<0.000000e+00> : vector<8xf32>
    %116 = vector.multi_reduction <add>, %115, %cst_40 [1] : vector<8x128xf32> to vector<8xf32>
    %117 = vector.shape_cast %116 : vector<8xf32> to vector<8x1xf32>
    %cst_41 = arith.constant 1.280000e+02 : f32
    %118 = vector.broadcast %cst_41 : f32 to vector<8x1xf32>
    %119 = arith.divf %117, %118 : vector<8x1xf32>
    %120 = vector.broadcast %110 : vector<8x1xf32> to vector<8x128xf32>
    %121 = arith.subf %106, %120 : vector<8x128xf32>
    %cst_42 = arith.constant 9.99999974E-6 : f32
    %122 = vector.broadcast %cst_42 : f32 to vector<8x1xf32>
    %123 = arith.addf %119, %122 : vector<8x1xf32>
    %124 = math.rsqrt %123 : vector<8x1xf32>
    %125 = vector.broadcast %124 : vector<8x1xf32> to vector<8x128xf32>
    %126 = arith.mulf %121, %125 : vector<8x128xf32>
    %127 = vector.broadcast %2 : vector<1x128xf32> to vector<8x128xf32>
    %128 = arith.mulf %126, %127 : vector<8x128xf32>
    %129 = vector.broadcast %3 : vector<1x128xf32> to vector<8x128xf32>
    %130 = arith.addf %128, %129 : vector<8x128xf32>
    %c1 = arith.constant 1 : index
    %c0_43 = arith.constant 0 : index
    %c0_44 = arith.constant 0 : index
    %131 = vector.load %arg8[%c1, %c0_43, %c0_44] : memref<2x8x128xf32, #tpu.memory_space<vmem>>, vector<1x8x128xf32>
    %132 = vector.shape_cast %131 : vector<1x8x128xf32> to vector<8x128xf32>
    %133 = vector.shape_cast %130 : vector<8x128xf32> to vector<1x8x128xf32>
    tpu.vector_store %arg8[%c1, %c0_43, %c0_44], %133 {strides = array<i32>} : memref<2x8x128xf32, #tpu.memory_space<vmem>>, vector<1x8x128xf32>,
    return
  }
  func.func @transform_0(%arg0: i32) -> (i32, i32, i32) {
    %c0_i32 = arith.constant 0 : i32
    %c0_i32_0 = arith.constant 0 : i32
    %c0_i32_1 = arith.constant 0 : i32
    return %arg0, %c0_i32, %c0_i32_0 : i32, i32, i32
  }
  func.func @transform_1(%arg0: i32) -> (i32, i32) {
    %c0_i32 = arith.constant 0 : i32
    %c0_i32_0 = arith.constant 0 : i32
    %c0_i32_1 = arith.constant 0 : i32
    return %c0_i32, %c0_i32_0 : i32, i32
  }
  func.func @transform_2(%arg0: i32) -> (i32, i32) {
    %c0_i32 = arith.constant 0 : i32
    %c0_i32_0 = arith.constant 0 : i32
    %c0_i32_1 = arith.constant 0 : i32
    return %c0_i32, %c0_i32_0 : i32, i32
  }
  func.func @transform_3(%arg0: i32) -> (i32, i32) {
    %c0_i32 = arith.constant 0 : i32
    %c0_i32_0 = arith.constant 0 : i32
    %c0_i32_1 = arith.constant 0 : i32
    return %c0_i32, %c0_i32_0 : i32, i32
  }
  func.func @transform_4(%arg0: i32) -> (i32, i32) {
    %c0_i32 = arith.constant 0 : i32
    %c0_i32_0 = arith.constant 0 : i32
    %c0_i32_1 = arith.constant 0 : i32
    return %c0_i32, %c0_i32_0 : i32, i32
  }
  func.func @transform_5(%arg0: i32) -> (i32, i32) {
    %c0_i32 = arith.constant 0 : i32
    %c0_i32_0 = arith.constant 0 : i32
    %c0_i32_1 = arith.constant 0 : i32
    return %c0_i32, %c0_i32_0 : i32, i32
  }
  func.func @transform_6(%arg0: i32) -> (i32, i32) {
    %c0_i32 = arith.constant 0 : i32
    %c0_i32_0 = arith.constant 0 : i32
    %c0_i32_1 = arith.constant 0 : i32
    return %c0_i32, %c0_i32_0 : i32, i32
  }
  func.func @transform_7(%arg0: i32) -> (i32, i32, i32) {
    %c0_i32 = arith.constant 0 : i32
    %c0_i32_0 = arith.constant 0 : i32
    %c0_i32_1 = arith.constant 0 : i32
    return %arg0, %c0_i32, %c0_i32_0 : i32, i32, i32
  }
}

</mosaic_0001>

<bundles_post_ra>
// kernel: tpu_custom_call.1
= control target key start
LH: loop header
LB: loop body
LE: loop exit
PB: predicated region body
PF: predicated region fallthrough
CT: control target
= control target key end

     0   :  { %12 = vsyncpa [#allocation3], 0  ;;  %s1396_s0 = inlined_call_operand.hbm [shape: f32[4,8,128], index: 0, kind: input, shape index: {}]   ;;  %s1397_s1 = inlined_call_operand.hbm [shape: f32[128,128], index: 1, kind: input, shape index: {}]   ;;  %s1398_s2 = inlined_call_operand.vmem [shape: f32[1,128], index: 2, kind: input, shape index: {}]   ;;  %s1399_s3 = inlined_call_operand.vmem [shape: f32[8,8], index: 3, kind: input, shape index: {}]   ;;  %s1400_s4 = inlined_call_operand.vmem [shape: f32[8,1], index: 4, kind: input, shape index: {}]   ;;  %s1401_s5 = inlined_call_operand.vmem [shape: f32[1,128], index: 5, kind: input, shape index: {}]   ;;  %s1402_s6 = inlined_call_operand.vmem [shape: f32[1,128], index: 6, kind: input, shape index: {}]   ;;  %s1403_s7 = inlined_call_operand.hbm [shape: f32[4,8,128], index: 7, kind: output, shape index: {}]  }
   0x1   :  { %14 = vsyncpa [#allocation3 + $0x1], 0 }
   0x2   :  { %15 = vsyncpa [#allocation6], 0 }
   0x3   :  { %16 = vsyncpa [#allocation4], 0 }
   0x4   :  { %18 = vsyncpa [#allocation4 + $0x1], 0  ;;  %s1142_s24 = smov 0   ;;  %s1144_s25 = smov 0  }
   0x5   :  { %s1146_s26 = smov 0   ;;  %s1148_s27 = smov 0  }
   0x6 LB: > { %s1163_s28 = sadd.s32 4294967295, %s1090_s27   ;;  %s758_s29 = sadd.s32 4294967294, %s1090_s27   ;;  %s1090_s27 = sphi %s1148_s27, %s1425_s27   ;;  %s1086_s26 = sphi %s1146_s26, %s1424_s26   ;;  %s1082_s25 = sphi %s1144_s25, %s1423_s25   ;;  %s1078_s24 = sphi %s1142_s24, %s1422_s24  }
   0x7   : > { %p44_p0 = scmp.ne.s32.totalorder %s1082_s25, %s1078_s24  ;;  %p1404_p1 = scmp.eq.s32.totalorder %s1163_s28, 0 }
   0x8   : > { %p200_p3 = scmp.eq.s32.totalorder %s758_s29, 1  ;;  %p759_p5 = scmp.ge.s32.totalorder %s1090_s27, 1 }
   0x9   : > { %p1172_p4 = por %p1404_p1, %p44_p0  ;;  %p207_p7 = scmp.lt.s32.totalorder %s1090_s27, 3 }
   0xa   : > { %p1177_p6 = por %p200_p3, %p44_p0  ;;  %s1092_s10 = smov [#allocation5]  }
   0xb   : > { %s1408_s30 = scalar_select %p1172_p4, 1, 0 }
   0xc   : > { %s1409_s8 = scalar_select %p1177_p6, 1, 0 }
   0xd   : > { %p1182_p8 = pnand %p759_p5, %p207_p7  ;;  %s219_s11 = sshll.u32 %s1092_s10, 4  ;;  %s1186_s11 = int_to_ptr.vmem [resolvable:$true] %s219_s11 }
   0xe   : > { %s1198_s13 = sadd.s32 1, %s1090_s27   ;;  %s31_s14 = sadd.s32 1, %s1086_s26 }
   0xf   : > { %s1410_s9 = scalar_select %p1182_p8, 1, 0 }
  0x10   : > { %p889_p9 = pneg %p1182_p8  ;;  %s28_s15 = ssub.s32 %s1090_s27, %s1198_s13 }
  0x11   : > { %s962_s18 = scalar_lea.hbm %s1397_s1, 2048 }
  0x12   : > { %p1193_p11 = pnand %p889_p9, %p1404_p1  ;;  %p963_p12 = scmp.ne.s32.totalorder %s1397_s1, %s962_s18 }
  0x13   : > { %p969_p5 = scmp.lt.u32.totalorder %s962_s18, %s1397_s1 }
  0x14   : > { %p964_p13 = pneg %p1193_p11 }
  0x16   : > { %p965_p0 = pnand %p964_p13, %p963_p12 }
  0x18   : > { %p966_p3 = pneg %p965_p0 }
  0x1a   : > { %p971_p7 = pnand %p969_p5, %p966_p3 }
  0x1c   : > { %974 = shalt.err (!%p971_p7)
}
  0x1d   : > { %s975_s23 = scalar_lea.vmem %s1186_s11, 2048  ;;  %p983_p2 = scmp.lt.s32.totalorder %s1186_s11, %s1186_s11 }
  0x1e   : > { %p976_p9 = scmp.ne.s32.totalorder %s1186_s11, %s975_s23  ;;  %p984_p6 = scmp.lt.s32.totalorder %s975_s23, %s975_s23 }
  0x20   : > { %p978_p10 = pnand %p976_p9, %p964_p13  ;;  %p985_p4 = por %p984_p6, %p983_p2 }
  0x22   : > { %p979_p1 = pneg %p978_p10 }
  0x24   : > { %p986_p8 = pnand %p985_p4, %p979_p1 }
  0x26   : > { %989 = shalt.err (!%p986_p8)
}
  0x27   : > { %s1407_s29 = smov 128   ;;  %s1094_s10 = smov 8  }
  0x28   : > { %892 = dma.hbm_to_vmem [thread:$0]  (!%p1193_p11), %s1397_s1, 2048, %s1186_s11, [#allocation6], %s1407_s29, %s1407_s29, %s1094_s10  }
  0x29   : > { %p29_p1 = scmp.eq.s32.totalorder %s28_s15, 0  ;;  %p38_p2 = scmp.ne.s32.totalorder %s1086_s26, %s1082_s25 }
  0x2a   : > { %p39_p4 = scmp.eq.s32.totalorder %s1090_s27, 0  ;;  %p902_p6 = scmp.lt.s32.totalorder %s1090_s27, 2 }
  0x2b   : > { %s1232_s18 = scalar_select %p29_p1, %s1086_s26, %s31_s14  }
  0x2c   : > { %p40_p8 = por %p39_p4, %p38_p2  ;;  %p1412_p10 = scmp.eq.s32.totalorder %s1163_s28, 1 }
  0x2d   : > { %s248_s12 = sand.u32 1, %s1086_s26   ;;  %s780_s20 = sshll.u32 %s1090_s27, 8 }
  0x2e   : > { %p1236_p12 = por %p1412_p10, %p38_p2  ;;  %s762_s21 = sshll.u32 %s248_s12, 4 }
  0x2f   : > { %s1245_s16 = scalar_lea.hbm %s1396_s0, %s780_s20  ;;  %s252_s11 = scalar_lea.vmem [#allocation2], %s762_s21 }
  0x30   : > { %s259_s14 = sshll.u32 %s252_s11, 4  ;;  %p1247_p11 = pnand %p902_p6, %p40_p8  ;;  %s1251_s14 = int_to_ptr.vmem [resolvable:$true] %s259_s14 }
  0x31   : > { %s1253_s17 = scalar_lea.sflag [#allocation3], %s248_s12  ;;  %s990_s29 = scalar_lea.hbm %s1245_s16, 256 }
  0x32   : > { %p991_p13 = scmp.ne.s32.totalorder %s1245_s16, %s990_s29  ;;  %p992_p0 = pneg %p1247_p11 }
  0x33   : > { %s995_s22 = scalar_lea.hbm %s1396_s0, 512  ;;  %p996_p7 = scmp.lt.u32.totalorder %s1245_s16, %s1396_s0 }
  0x34   : > { %p993_p3 = pnand %p992_p0, %p991_p13  ;;  %p997_p9 = scmp.lt.u32.totalorder %s995_s22, %s990_s29 }
  0x35   : > { %p999_p2 = scmp.lt.u32.totalorder %s990_s29, %s1245_s16 }
  0x36   : > { %p994_p5 = pneg %p993_p3  ;;  %p998_p1 = por %p997_p9, %p996_p7 }
  0x38   : > { %p1000_p4 = por %p999_p2, %p998_p1 }
  0x3a   : > { %p1001_p6 = pnand %p1000_p4, %p994_p5 }
  0x3c   : > { %1004 = shalt.err (!%p1001_p6)
}
  0x3d   : > { %s1005_s12 = scalar_lea.vmem %s1251_s14, 256  ;;  %s1095_s20 = smov [#allocation2]  }
  0x3e   : > { %p1006_p8 = scmp.ne.s32.totalorder %s1251_s14, %s1005_s12  ;;  %s1010_s21 = sshll.u32 %s1095_s20, 4  ;;  %s1011_s21 = int_to_ptr.vmem [resolvable:$false] %s1010_s21 }
  0x3f   : > { %s1012_s23 = scalar_lea.vmem %s1011_s21, 512  ;;  %p1013_p3 = scmp.lt.s32.totalorder %s1251_s14, %s1011_s21 }
  0x40   : > { %p1008_p10 = pnand %p1006_p8, %p992_p0  ;;  %p1014_p7 = scmp.lt.s32.totalorder %s1012_s23, %s1005_s12 }
  0x42   : > { %p1009_p13 = pneg %p1008_p10  ;;  %p1015_p9 = por %p1014_p7, %p1013_p3 }
  0x44   : > { %p1016_p1 = pnand %p1015_p9, %p1009_p13 }
  0x46   : > { %1019 = shalt.err (!%p1016_p1)
}
  0x47   : > { %s1415_s29 = smov 128   ;;  %p1416_p0 = scmp.ne.s32.totalorder %s1410_s9, 0 }
  0x48   : > { %896 = dma.hbm_to_vmem [thread:$0]  (!%p1247_p11), %s1245_s16, 256, %s1251_s14, %s1253_s17, %s1415_s29, %s1415_s29, %s1094_s10  }
  0x49   : > { %271 = sbr.rel (%p1416_p0) target bundleno = 1230 (0x4ce), region = 48  ;;  %s1287_s22 = sand.u32 (!%p1416_p0), 1, %s1082_s25  }
  0x4a   : > { %s766_s11 = sshll.u32 (!%p1416_p0), %s1287_s22, 4  ;;  %s274_s12 = scalar_lea.sflag (!%p1416_p0), [#allocation3], %s1287_s22 }
  0x4b   : > { %s1293_s15 = scalar_lea.vmem (!%p1416_p0), [#allocation2], %s766_s11  ;;  %p1417_p5 = scmp.ne.s32.totalorder (!%p1416_p0), %s1408_s30, 0 }
  0x50   : > { %1065 = dma.done.wait (%p1417_p5), %s274_s12, 256  }
  0x51   : > { %1067 = vsyncadd (%p1417_p5), %s274_s12, 4294967040  ;;  %p1418_p11 = scmp.eq.s32.totalorder %s1163_s28, 0 }
  0x53   : > { %1069 = dma.done.wait (%p1418_p11), [#allocation6], 2048   ;;  %p1419_p2 = pmov %p1418_p11 }
  0x54   : > { %v320_v0 = vld [vmem:[#allocation5] sm:$0xff]  ;;  %v321_v1 = vld [vmem:[#allocation5 + $0x8] sm:$0xff]  ;;  %v322_v2 = vld [vmem:[#allocation5 + $0x10] sm:$0xff]  ;;  %v1096_v51 = vmov 0.0   ;;  %vm1097_vm0 = vmmov 0   ;;  %v1098_v53 = vmov 0  }
  0x55   : > { %1071 = vsyncadd (%p1419_p2), [#allocation6], 4294965248  ;;  %v849_v3 = vpack.c.bf16 %v321_v1, %v320_v0  ;;  %v323_v4 = vld [vmem:[#allocation5 + $0x18] sm:$0xff]  ;;  %v324_v6 = vld [vmem:[#allocation5 + $0x20] sm:$0xff]  ;;  %839 = vmatprep.subr.mxu1 %v1096_v51  ;;  %841 = vmatprep.mubr.msk.f32.mxu1 %vm1097_vm0, %v1096_v51  ;;  %vm474_vm1 = vcmask 64512   ;;  %s781_s12 = sshll.u32 %s1163_s28, 8 }
  0x56   : > { %v853_v5 = vpack.c.bf16 %v323_v4, %v322_v2  ;;  %v325_v7 = vld [vmem:[#allocation5 + $0x28] sm:$0xff]  ;;  %v1304_v9 = vld [vmem:[%s1293_s15] sm:$0xff]  ;;  %v327_v11 = vld [vmem:[#allocation5 + $0x38] sm:$0xff]  ;;  %945 = vset.pattern.permute.xlu0 %v1098_v53  ;;  %s1349_s16 = scalar_lea.hbm %s1403_s7, %s781_s12  ;;  %s662_s28 = scalar_lea.sflag [#allocation4], %s1287_s22 }
  0x57   : > { %850 = vmatprep.subr.bf16.mxu0 %v849_v3  ;;  %v857_v8 = vpack.c.bf16 %v325_v7, %v324_v6  ;;  %v326_v10 = vld [vmem:[#allocation5 + $0x30] sm:$0xff]  ;;  %836 = vmatprep.mubr.f32.mxu0 %v1304_v9  ;;  %v328_v13 = vld [vmem:[#allocation5 + $0x40] sm:$0xff]  ;;  %v329_v14 = vld [vmem:[#allocation5 + $0x48] sm:$0xff] }
  0x58   : > { %852 = vmatpush3.bf16.msra.mxu0 %v849_v3  ;;  %v861_v12 = vpack.c.bf16 %v327_v11, %v326_v10  ;;  %v865_v15 = vpack.c.bf16 %v329_v14, %v328_v13  ;;  %v330_v16 = vld [vmem:[#allocation5 + $0x50] sm:$0xff]  ;;  %v331_v17 = vld [vmem:[#allocation5 + $0x58] sm:$0xff]  ;;  %v332_v19 = vld [vmem:[#allocation5 + $0x60] sm:$0xff] }
  0x59   : > { %854 = vmatprep.subr.bf16.mxu0 %v853_v5  ;;  %v869_v18 = vpack.c.bf16 %v331_v17, %v330_v16  ;;  %v333_v20 = vld [vmem:[#allocation5 + $0x68] sm:$0xff]  ;;  %v334_v22 = vld [vmem:[#allocation5 + $0x70] sm:$0xff]  ;;  %v335_v23 = vld [vmem:[#allocation5 + $0x78] sm:$0xff] }
  0x5a   : > { %v873_v21 = vpack.c.bf16 %v333_v20, %v332_v19  ;;  %v877_v24 = vpack.c.bf16 %v335_v23, %v334_v22  ;;  %v1308_v25 = vld [vmem:[%s1293_s15 + $0x8] sm:$0xff]  ;;  %v769_v26 = vld [vmem:[%s1398_s2] ss:$0 sm:$0xff]  ;;  %s311_s15 = scalar_lea.vmem [#allocation7], %s766_s11  ;;  %s1099_s11 = smov [#allocation7]  }
  0x5b   : > { %v315_v52 = vld [vmem:[%s1400_s4] sm:$0xff]  ;;  %s675_s30 = sshll.u32 %s311_s15, 4  ;;  %s1024_s17 = sshll.u32 %s1099_s11, 4  ;;  %s1351_s30 = int_to_ptr.vmem [resolvable:$true] %s675_s30  ;;  %s1025_s17 = int_to_ptr.vmem [resolvable:$false] %s1024_s17 }
  0x5c   : > { %856 = vmatpush3.bf16.msra.mxu0 %v853_v5  ;;  %v1323_v61 = vld [vmem:[%s1401_s5] ss:$0 sm:$0xff]  ;;  %s1020_s14 = scalar_lea.vmem %s1351_s30, 256  ;;  %s1026_s20 = scalar_lea.vmem %s1025_s17, 512 }
  0x5d   : > { %858 = vmatprep.subr.bf16.mxu0 %v857_v8  ;;  %v1328_v63 = vld [vmem:[%s1402_s6] ss:$0 sm:$0xff]  ;;  %p1021_p4 = scmp.ne.s32.totalorder %s1351_s30, %s1020_s14  ;;  %p1027_p10 = scmp.lt.s32.totalorder %s1351_s30, %s1025_s17 }
  0x5e   : > { %v468_v3 = vld [vmem:[%s1399_s3] sm:$0xff]  ;;  %p1028_p13 = scmp.lt.s32.totalorder %s1026_s20, %s1020_s14 }
  0x5f   : > { %p1022_p6 = pnand %p1021_p4, %p1236_p12 }
  0x60   : > { %860 = vmatpush3.bf16.msra.mxu0 %v857_v8  ;;  %p1029_p3 = por %p1028_p13, %p1027_p10 }
  0x61   : > { %862 = vmatprep.subr.bf16.mxu0 %v861_v12  ;;  %p1023_p8 = pneg %p1022_p6 }
  0x63   : > { %p1030_p7 = pnand %p1029_p3, %p1023_p8 }
  0x64   : > { %864 = vmatpush3.bf16.msra.mxu0 %v861_v12 }
  0x65   : > { %866 = vmatprep.subr.bf16.mxu0 %v865_v15 }
  0x68   : > { %868 = vmatpush3.bf16.msra.mxu0 %v865_v15 }
  0x69   : > { %870 = vmatprep.subr.bf16.mxu0 %v869_v18 }
  0x6c   : > { %872 = vmatpush3.bf16.msra.mxu0 %v869_v18 }
  0x6d   : > { %874 = vmatprep.subr.bf16.mxu0 %v873_v21 }
  0x70   : > { %876 = vmatpush3.bf16.msra.mxu0 %v873_v21 }
  0x71   : > { %878 = vmatprep.subr.bf16.mxu0 %v877_v24 }
  0x74   : > { %880 = vmatpush3.bf16.msra.mxu0 %v877_v24 }
  0x77   : > { %837 = vmatmul.mubr.f32.vlgmr.msra.gmra.mrb[0].mxu0 %v1308_v25 }
 0x14a   : > { %v838_v27 = vpop.f32.mrb[0].mxu0 }
 0x14b   : > { %v414_v28 = vadd.f32 %v838_v27, %v769_v26  ;;  %v408_v29 = vpop.f32.mrb[1].mxu0 }
 0x14c   : > { %v409_v30 = vadd.f32 %v769_v26, %v408_v29 }
 0x14d   : > { %v420_v31 = vmul.f32 0.70710677, %v414_v28  ;;  %v418_v38 = vmul.f32 0.5, %v414_v28 }
 0x14e   : > { %v419_v32 = vmul.f32 0.70710677, %v409_v30  ;;  %v417_v35 = vmul.f32 0.5, %v409_v30 }
 0x14f   : > { %946 = verf.f32 %v420_v31 }
 0x150   : > { %948 = verf.f32 %v419_v32 }
 0x159   : > { %v947_v33 = vpop.eup %946 }
 0x15a   : > { %v949_v34 = vpop.eup %948  ;;  %v424_v37 = vadd.f32 1.0, %v947_v33 }
 0x15b   : > { %v423_v36 = vadd.f32 1.0, %v949_v34 }
 0x15c   : > { %v426_v41 = vmul.f32 %v424_v37, %v418_v38 }
 0x15d   : > { %v425_v39 = vmul.f32 %v423_v36, %v417_v35 }
 0x15e   : > { %v428_v42 = vadd.f32 %v426_v41, %v1308_v25 }
 0x15f   : > { %v427_v40 = vadd.f32 %v425_v39, %v1304_v9 }
 0x161   : > { %429 = vadd.xlane.f32.xlu0 %v427_v40 }
 0x165   : > { %431 = vadd.xlane.f32.xlu0 %v428_v42 }
 0x17b   : > { %471 = vperm.xlu0 %945, %v315_v52  }
 0x1ee   : > { %v430_v43 = vpop.xlane.xlu0 %429 }
 0x1ef   : > { %v434_v44 = vmul.f32 0.0078125, %v430_v43 }
 0x1f1   : > { %v436_v45 = vsub.f32 %v427_v40, %v434_v44 }
 0x1f2   : > { %v432_v46 = vpop.xlane.xlu0 %431 }
 0x1f3   : > { %v435_v47 = vmul.f32 0.0078125, %v432_v46  ;;  %v438_v48 = vmul.f32 %v436_v45, %v436_v45 }
 0x1f5   : > { %v437_v49 = vsub.f32 %v428_v42, %v435_v47  ;;  %440 = vadd.xlane.f32.xlu1 %v438_v48 }
 0x1f7   : > { %v439_v50 = vmul.f32 %v437_v49, %v437_v49 }
 0x1f9   : > { %442 = vadd.xlane.f32.xlu1 %v439_v50 }
 0x1fa   : > { %v472_v7 = vpop.permute.xlu0 %471 }
 0x282   : > { %v441_v54 = vpop.xlane.xlu1 %440 }
 0x283   : > { %v444_v55 = vmul.f32 0.0078125, %v441_v54 }
 0x285   : > { %v446_v56 = vadd.f32 1e-05, %v444_v55 }
 0x286   : > { %v443_v57 = vpop.xlane.xlu1 %442 }
 0x287   : > { %950 = vrsqrt.f32 %v446_v56  ;;  %v445_v58 = vmul.f32 0.0078125, %v443_v57 }
 0x289   : > { %v447_v59 = vadd.f32 1e-05, %v445_v58 }
 0x28b   : > { %952 = vrsqrt.f32 %v447_v59 }
 0x291   : > { %v951_v60 = vpop.eup %950 }
 0x292   : > { %v450_v62 = vmul.f32 %v951_v60, %v436_v45 }
 0x294   : > { %v458_v0 = vmul.f32 %v1323_v61, %v450_v62 }
 0x295   : > { %v953_v1 = vpop.eup %952 }
 0x296   : > { %v466_v2 = vadd.f32 %v1328_v63, %v458_v0  ;;  %v451_v4 = vmul.f32 %v953_v1, %v437_v49 }
 0x298   : > { %840 = vmatpush3.msra.mxu1 %v466_v2  ;;  %v459_v5 = vmul.f32 %v1323_v61, %v451_v4 }
 0x299   : > { %842 = vmatmul.mubr.msk.f32.vlgmr.msra.gmra.mrb[0].mxu1 %vm474_vm1, %v468_v3  ;;  %844 = vmatprep.subr.mxu1 %v1096_v51 }
 0x29a   : > { %v467_v6 = vadd.f32 %v1328_v63, %v459_v5  ;;  %846 = vmatprep.mubr.msk.f32.mxu1 %vm1097_vm0, %v1096_v51 }
 0x29c   : > { %845 = vmatpush3.msra.mxu1 %v467_v6 }
 0x29d   : > { %847 = vmatmul.mubr.msk.f32.vlgmr.msra.gmra.mrb[2].mxu1 %vm474_vm1, %v468_v3 }
 0x36c   : > { %v544_v8 = vpop.f32.mrb[0].mxu1 }
 0x36d   : > { %v545_v10 = vadd.f32 %v544_v8, %v472_v7  ;;  %v843_v11 = vpop.f32.mrb[1].mxu1 }
 0x36f   : > { %v549_v12 = vmul.f32 0.70710677, %v545_v10  ;;  %v548_v18 = vmul.f32 0.5, %v545_v10 }
 0x370   : > { %v635_v13 = vpop.f32.mrb[2].mxu1 }
 0x371   : > { %954 = verf.f32 %v549_v12  ;;  %v636_v14 = vadd.f32 %v635_v13, %v472_v7  ;;  %v848_v15 = vpop.f32.mrb[3].mxu1 }
 0x373   : > { %v640_v16 = vmul.f32 0.70710677, %v636_v14  ;;  %v639_v22 = vmul.f32 0.5, %v636_v14 }
 0x375   : > { %956 = verf.f32 %v640_v16 }
 0x37b   : > { %v955_v17 = vpop.eup %954 }
 0x37c   : > { %v551_v19 = vadd.f32 1.0, %v955_v17 }
 0x37e   : > { %v552_v20 = vmul.f32 %v551_v19, %v548_v18 }
 0x37f   : > { %v957_v21 = vpop.eup %956 }
 0x380   : > { %v642_v23 = vadd.f32 1.0, %v957_v21  ;;  %v553_v24 = vmul.f32 %v552_v20, %v466_v2 }
 0x382   : > { %v643_v26 = vmul.f32 %v642_v23, %v639_v22  ;;  %v554_v27 = vadd.f32 %v553_v24, %v1304_v9 }
 0x384   : > { %555 = vadd.xlane.f32.xlu1 %v554_v27  ;;  %v644_v28 = vmul.f32 %v643_v26, %v467_v6 }
 0x386   : > { %v645_v29 = vadd.f32 %v644_v28, %v1308_v25 }
 0x388   : > { %646 = vadd.xlane.f32.xlu1 %v645_v29 }
 0x411   : > { %v556_v30 = vpop.xlane.xlu1 %555 }
 0x412   : > { %v557_v31 = vmul.f32 0.0078125, %v556_v30 }
 0x414   : > { %v558_v32 = vsub.f32 %v554_v27, %v557_v31 }
 0x415   : > { %v647_v33 = vpop.xlane.xlu1 %646 }
 0x416   : > { %v648_v34 = vmul.f32 0.0078125, %v647_v33  ;;  %v559_v35 = vmul.f32 %v558_v32, %v558_v32 }
 0x418   : > { %v649_v36 = vsub.f32 %v645_v29, %v648_v34  ;;  %560 = vadd.xlane.f32.xlu1 %v559_v35 }
 0x41a   : > { %v650_v37 = vmul.f32 %v649_v36, %v649_v36 }
 0x41c   : > { %651 = vadd.xlane.f32.xlu1 %v650_v37 }
 0x4a5   : > { %v561_v38 = vpop.xlane.xlu1 %560 }
 0x4a6   : > { %v562_v39 = vmul.f32 0.0078125, %v561_v38 }
 0x4a8   : > { %v563_v9 = vadd.f32 1e-05, %v562_v39 }
 0x4a9   : > { %v652_v40 = vpop.xlane.xlu1 %651 }
 0x4aa   : > { %958 = vrsqrt.f32 %v563_v9  ;;  %v653_v41 = vmul.f32 0.0078125, %v652_v40 }
 0x4ac   : > { %v654_v25 = vadd.f32 1e-05, %v653_v41 }
 0x4ae   : > { %960 = vrsqrt.f32 %v654_v25 }
 0x4b4   : > { %v959_v42 = vpop.eup %958 }
 0x4b5   : > { %v565_v43 = vmul.f32 %v959_v42, %v558_v32 }
 0x4b7   : > { %v566_v44 = vmul.f32 %v1323_v61, %v565_v43 }
 0x4b8   : > { %v961_v45 = vpop.eup %960 }
 0x4b9   : > { %v567_v46 = vadd.f32 %v1328_v63, %v566_v44  ;;  %v656_v47 = vmul.f32 %v961_v45, %v649_v36 }
 0x4bb   : > { %v657_v48 = vmul.f32 %v1323_v61, %v656_v47  ;;  %568 = vst [vmem:[%s311_s15] sm:$0xff] %v567_v46 }
 0x4bd   : > { %v658_v49 = vadd.f32 %v1328_v63, %v657_v48 }
 0x4bf   : > { %774 = vst [vmem:[%s311_s15 + $0x8] sm:$0xff] %v658_v49 }
 0x4c0   : > { %1033 = shalt.err (!%p1030_p7)
}
 0x4c1   : > { %s1034_s21 = scalar_lea.hbm %s1349_s16, 256  ;;  %s1038_s12 = scalar_lea.hbm %s1403_s7, 512 }
 0x4c2   : > { %p1035_p9 = scmp.ne.s32.totalorder %s1349_s16, %s1034_s21  ;;  %p1039_p5 = scmp.lt.u32.totalorder %s1349_s16, %s1403_s7 }
 0x4c3   : > { %p1040_p11 = scmp.lt.u32.totalorder %s1038_s12, %s1034_s21  ;;  %p1042_p4 = scmp.lt.u32.totalorder %s1034_s21, %s1349_s16 }
 0x4c4   : > { %p1036_p1 = pnand %p1035_p9, %p1236_p12 }
 0x4c5   : > { %p1041_p2 = por %p1040_p11, %p1039_p5 }
 0x4c6   : > { %p1037_p0 = pneg %p1036_p1 }
 0x4c7   : > { %p1043_p6 = por %p1042_p4, %p1041_p2 }
 0x4c9   : > { %p1044_p8 = pnand %p1043_p6, %p1037_p0 }
 0x4cb   : > { %1047 = shalt.err (!%p1044_p8)
}
 0x4cc   : > { %s1100_s10 = smov 128   ;;  %s1101_s14 = smov 8  }
 0x4cd   : > { %887 = dma.vmem_to_hbm [thread:$0]  (%p1236_p12), %s1351_s30, 256, %s1349_s16, %s662_s28, %s1100_s10, %s1100_s10, %s1101_s14  }
 0x4ce PF: > { %s690_s11 = sand.u32 1, %s1078_s24   ;;  %p1420_p10 = scmp.ne.s32.totalorder %s1409_s8, 0 }
 0x4cf   : > { %p1421_p13 = scmp.ge.s32.totalorder %s1090_s27, 2  ;;  %s691_s17 = scalar_lea.sflag [#allocation4], %s690_s11 }
 0x4d1   : > { %p898_p3 = pnand %p1421_p13, %p1420_p10 }
 0x4d3   : > { %1073 = dma.done.wait (!%p898_p3), %s691_s17, 256  }
 0x4d4   : > { %1075 = vsyncadd (!%p898_p3), %s691_s17, 4294967040  ;;  %p21_p7 = scmp.ge.s32.totalorder %s1198_s13, 4   ;;  %s1422_s24 = smov %s1082_s25 }
 0x4d5   : > { %s1423_s25 = smov %s1086_s26  ;;  %s1424_s26 = smov %s1232_s18 }
 0x4d6   : > { %s1425_s27 = smov %s1198_s13  ;;  %23 = sbr.rel (!%p21_p7) target bundleno = 6 (0x6), region = 98 }
 0x4dd   :  { %696 = vsyncpa [#allocation3], 1 }
 0x4de   :  { %698 = vsyncpa [#allocation3 + $0x1], 1 }
 0x4df   :  { %699 = vsyncpa [#allocation6], 1 }
 0x4e0   :  { %700 = vsyncpa [#allocation4], 1 }
 0x4e1   :  { %702 = vsyncpa [#allocation4 + $0x1], 1 }

</bundles_post_ra>
